<compile_context>
chip_gen: v7x
topology: tpu7x:2x2x1
jax: 0.10.0
libtpu: 0.0.40
codegen_flags: <defaults>
</compile_context>

<pallas_src>
import jax
import jax.numpy as jnp
from jax.experimental import pallas as pl
from jax.experimental.pallas import tpu as pltpu


def citl_kernel(kf_ref, encb_ref,
                w_kf_ref,      # (E+I+D, C)  stacked [We_kf^T; Wi_kf^T; Wd_kf^T]
                w_e_ref,       # (I+D, E)    stacked [Wi_e^T; Wd_e^T]
                wd_i_ref,      # (D, I)
                bi_ref,        # (I, 1)
                bd_ref,        # (D, 1)
                out_ref):
    E = encb_ref.shape[1]
    I = bi_ref.shape[0]

    kf = kf_ref[0].astype(jnp.float32)                       # (C, TN)

    # One MXU pass serving encoder / interm / decoder keyframe projections.
    kf_proj = jnp.dot(w_kf_ref[...], kf,
                      preferred_element_type=jnp.float32)    # (E+I+D, TN)

    # encoder: relu(We_kf^T @ kf + (pose @ We_p + be)^T)  (pose part folded).
    enc = jnp.maximum(kf_proj[:E] + encb_ref[0], 0.0)        # (E, TN)

    # One MXU pass serving interm / decoder encoder projections.
    e_proj = jnp.dot(w_e_ref[...], enc,
                     preferred_element_type=jnp.float32)     # (I+D, TN)

    # interm: relu(Wi_kf^T @ kf + Wi_e^T @ enc + bi)
    itm = jnp.maximum(kf_proj[E:E + I] + e_proj[:I] + bi_ref[...], 0.0)  # (I, TN)

    # decoder: Wd_e^T @ enc + Wd_i^T @ itm + Wd_kf^T @ kf + bd
    dec = (kf_proj[E + I:] + e_proj[I:] + bd_ref[...]
           + jnp.dot(wd_i_ref[...], itm,
                     preferred_element_type=jnp.float32))    # (D, TN)

    out_ref[0] = dec.astype(out_ref.dtype)


def citl_forward(poses, keyframes, params, *, tile_n=2048):
    """poses: [B, P] f32, keyframes: [B, C, H, W] f32 (NCHW). Returns [B, D, H, W]."""
    (we_kf, we_p, be, wi_kf, wi_e, bi, wd_e, wd_i, wd_kf, bd) = params
    B, C, H, W = keyframes.shape
    E = we_kf.shape[1]
    I = wi_kf.shape[1]
    D = wd_kf.shape[1]
    HW = H * W

    tile_n = min(tile_n, HW)
    assert HW % tile_n == 0, "H*W must be a multiple of tile_n"
    assert tile_n % 128 == 0 or tile_n == HW, "tile_n must be lane-aligned"
    # Sublane-aligned row splits of the fused matmul outputs (perf, not corr.).
    assert E % 8 == 0 and I % 8 == 0, "E and I should be multiples of 8"

    # NCHW already gives the feature-major layout for free.
    kf3 = keyframes.reshape(B, C, HW)                         # (B, C, HW)

    # Fold the (per-batch constant) pose path + encoder bias: [B, E, 1].
    enc_bias = (poses @ we_p + be)[:, :, None].astype(jnp.float32)

    # Stack pre-transposed weights ([out, in]) so each activation feeds one
    # fused MXU pass for all of its consumers.
    w_kf_all = jnp.concatenate([we_kf.T, wi_kf.T, wd_kf.T], axis=0)  # (E+I+D, C)
    w_e_all = jnp.concatenate([wi_e.T, wd_e.T], axis=0)              # (I+D, E)
    wd_i_T = wd_i.T                                                  # (D, I)
    bi_col = bi.T                                                    # (I, 1)
    bd_col = bd.T                                                    # (D, 1)

    def full2d(arr):
        return pl.BlockSpec(arr.shape, lambda b, t: (0, 0))

    out3 = pl.pallas_call(
        citl_kernel,
        out_shape=jax.ShapeDtypeStruct((B, D, HW), keyframes.dtype),
        grid_spec=pltpu.PrefetchScalarGridSpec(
            num_scalar_prefetch=0,
            grid=(B, HW // tile_n),
            in_specs=[
                pl.BlockSpec((1, C, tile_n), lambda b, t: (b, 0, t)),  # keyframes
                pl.BlockSpec((1, E, 1), lambda b, t: (b, 0, 0)),       # pose-folded bias
                full2d(w_kf_all),
                full2d(w_e_all),
                full2d(wd_i_T),
                full2d(bi_col),
                full2d(bd_col),
            ],
            out_specs=pl.BlockSpec((1, D, tile_n), lambda b, t: (b, 0, t)),
        ),
        compiler_params=pltpu.CompilerParams(
            dimension_semantics=("parallel", "parallel")),
    )(kf3, enc_bias, w_kf_all, w_e_all, wd_i_T, bi_col, bd_col)

    return out3.reshape(B, D, H, W)


def citl_reference(poses, keyframes, params):
    """Pure-JAX reference of the same synthetic CITL forward."""
    (we_kf, we_p, be, wi_kf, wi_e, bi, wd_e, wd_i, wd_kf, bd) = params
    B, C, H, W = keyframes.shape
    kf = jnp.transpose(keyframes, (0, 2, 3, 1)).reshape(B * H * W, C)
    pz = jnp.repeat(poses, H * W, axis=0)
    enc = jnp.maximum(pz @ we_p + kf @ we_kf + be, 0.0)
    itm = jnp.maximum(kf @ wi_kf + enc @ wi_e + bi, 0.0)
    dec = enc @ wd_e + itm @ wd_i + kf @ wd_kf + bd
    D = wd_kf.shape[1]
    return jnp.transpose(dec.reshape(B, H, W, D), (0, 3, 1, 2))


def init_params(key, C, P, E, I, D):
    ks = jax.random.split(key, 10)
    s = 0.1
    return (
        s * jax.random.normal(ks[0], (C, E), jnp.float32),  # we_kf
        s * jax.random.normal(ks[1], (P, E), jnp.float32),  # we_p
        s * jax.random.normal(ks[2], (1, E), jnp.float32),  # be
        s * jax.random.normal(ks[3], (C, I), jnp.float32),  # wi_kf
        s * jax.random.normal(ks[4], (E, I), jnp.float32),  # wi_e
        s * jax.random.normal(ks[5], (1, I), jnp.float32),  # bi
        s * jax.random.normal(ks[6], (E, D), jnp.float32),  # wd_e
        s * jax.random.normal(ks[7], (I, D), jnp.float32),  # wd_i
        s * jax.random.normal(ks[8], (C, D), jnp.float32),  # wd_kf
        s * jax.random.normal(ks[9], (1, D), jnp.float32),  # bd
    )


if __name__ == "__main__":
    B, C, H, W = 2, 4, 16, 16       # keyframes: NCHW
    P, E, I, D = 8, 32, 32, 4       # pose dim, encoder/interm widths, output channels

    key = jax.random.PRNGKey(0)
    k_pose, k_kf, k_param = jax.random.split(key, 3)
    poses = jax.random.normal(k_pose, (B, P), jnp.float32)
    keyframes = jax.random.normal(k_kf, (B, C, H, W), jnp.float32)
    params = init_params(k_param, C, P, E, I, D)

    out = citl_forward(poses, keyframes, params)
    out = jax.block_until_ready(out)

    ref = citl_reference(poses, keyframes, params)
    assert out.shape == (B, D, H, W)
    assert jnp.allclose(out, ref, atol=1e-4, rtol=1e-4), "mismatch vs reference"

    print("KERNEL_OK")
</pallas_src>

<mosaic_0001>
module attributes {stable_mosaic.version = 11 : i64} {
  func.func @citl_kernel(%arg0: i32, %arg1: i32, %arg2: memref<1x4x256xf32, #tpu.memory_space<vmem>>, %arg3: memref<1x32x1xf32, #tpu.memory_space<vmem>>, %arg4: memref<68x4xf32, #tpu.memory_space<vmem>>, %arg5: memref<36x32xf32, #tpu.memory_space<vmem>>, %arg6: memref<4x32xf32, #tpu.memory_space<vmem>>, %arg7: memref<32x1xf32, #tpu.memory_space<vmem>>, %arg8: memref<4x1xf32, #tpu.memory_space<vmem>>, %arg9: memref<1x4x256xf32, #tpu.memory_space<vmem>>) attributes {dimension_semantics = [#tpu.dimension_semantics<parallel>, #tpu.dimension_semantics<parallel>], iteration_bounds = array<i64: 2, 1>, scalar_prefetch = 0 : i64, scratch_operands = 0 : i64, tpu.core_type = #tpu.core_type<tc>, window_params = [{transform_indices = @transform_0, window_bounds = array<i64: 1, 4, 256>}, {transform_indices = @transform_1, window_bounds = array<i64: 1, 32, 1>}, {pipeline_mode = #tpu.pipeline_mode<synchronous>, transform_indices = @transform_2, window_bounds = array<i64: 68, 4>}, {pipeline_mode = #tpu.pipeline_mode<synchronous>, transform_indices = @transform_3, window_bounds = array<i64: 36, 32>}, {pipeline_mode = #tpu.pipeline_mode<synchronous>, transform_indices = @transform_4, window_bounds = array<i64: 4, 32>}, {pipeline_mode = #tpu.pipeline_mode<synchronous>, transform_indices = @transform_5, window_bounds = array<i64: 32, 1>}, {pipeline_mode = #tpu.pipeline_mode<synchronous>, transform_indices = @transform_6, window_bounds = array<i64: 4, 1>}, {transform_indices = @transform_7, window_bounds = array<i64: 1, 4, 256>}]} {
    %c0 = arith.constant 0 : index
    %c0_0 = arith.constant 0 : index
    %c0_1 = arith.constant 0 : index
    %0 = vector.load %arg2[%c0, %c0_0, %c0_1] : memref<1x4x256xf32, #tpu.memory_space<vmem>>, vector<1x4x256xf32>
    %1 = vector.shape_cast %0 : vector<1x4x256xf32> to vector<4x256xf32>
    %c0_2 = arith.constant 0 : index
    %c0_3 = arith.constant 0 : index
    %2 = vector.load %arg4[%c0_2, %c0_3] : memref<68x4xf32, #tpu.memory_space<vmem>>, vector<68x4xf32>
    %cst = arith.constant dense<0.000000e+00> : vector<68x256xf32>
    %3 = tpu.matmul %2, %1, %cst {dimension_numbers = #tpu.dot_dimension_numbers<[1], [0], [0], [1], [0, 0, 1, 1], [], []>} : vector<68x4xf32>, vector<4x256xf32>, vector<68x256xf32> -> vector<68x256xf32>
    %4 = vector.extract_strided_slice %3 {offsets = [0, 0], sizes = [32, 256], strides = [1, 1]} : vector<68x256xf32> to vector<32x256xf32>
    %c0_4 = arith.constant 0 : index
    %c0_5 = arith.constant 0 : index
    %c0_6 = arith.constant 0 : index
    %5 = vector.load %arg3[%c0_4, %c0_5, %c0_6] : memref<1x32x1xf32, #tpu.memory_space<vmem>>, vector<1x32x1xf32>
    %6 = vector.shape_cast %5 : vector<1x32x1xf32> to vector<32x1xf32>
    %7 = vector.broadcast %6 : vector<32x1xf32> to vector<32x256xf32>
    %8 = arith.addf %4, %7 : vector<32x256xf32>
    %cst_7 = arith.constant 0.000000e+00 : f32
    %9 = vector.broadcast %cst_7 : f32 to vector<32x256xf32>
    %10 = arith.maximumf %8, %9 : vector<32x256xf32>
    %c0_8 = arith.constant 0 : index
    %c0_9 = arith.constant 0 : index
    %11 = vector.load %arg5[%c0_8, %c0_9] : memref<36x32xf32, #tpu.memory_space<vmem>>, vector<36x32xf32>
    %cst_10 = arith.constant dense<0.000000e+00> : vector<36x256xf32>
    %12 = tpu.matmul %11, %10, %cst_10 {dimension_numbers = #tpu.dot_dimension_numbers<[1], [0], [0], [1], [0, 0, 1, 1], [], []>} : vector<36x32xf32>, vector<32x256xf32>, vector<36x256xf32> -> vector<36x256xf32>
    %13 = vector.extract_strided_slice %3 {offsets = [32, 0], sizes = [32, 256], strides = [1, 1]} : vector<68x256xf32> to vector<32x256xf32>
    %14 = vector.extract_strided_slice %12 {offsets = [0, 0], sizes = [32, 256], strides = [1, 1]} : vector<36x256xf32> to vector<32x256xf32>
    %15 = arith.addf %13, %14 : vector<32x256xf32>
    %c0_11 = arith.constant 0 : index
    %c0_12 = arith.constant 0 : index
    %16 = vector.load %arg7[%c0_11, %c0_12] : memref<32x1xf32, #tpu.memory_space<vmem>>, vector<32x1xf32>
    %17 = vector.broadcast %16 : vector<32x1xf32> to vector<32x256xf32>
    %18 = arith.addf %15, %17 : vector<32x256xf32>
    %cst_13 = arith.constant 0.000000e+00 : f32
    %19 = vector.broadcast %cst_13 : f32 to vector<32x256xf32>
    %20 = arith.maximumf %18, %19 : vector<32x256xf32>
    %21 = vector.extract_strided_slice %3 {offsets = [64, 0], sizes = [4, 256], strides = [1, 1]} : vector<68x256xf32> to vector<4x256xf32>
    %22 = vector.extract_strided_slice %12 {offsets = [32, 0], sizes = [4, 256], strides = [1, 1]} : vector<36x256xf32> to vector<4x256xf32>
    %23 = arith.addf %21, %22 : vector<4x256xf32>
    %c0_14 = arith.constant 0 : index
    %c0_15 = arith.constant 0 : index
    %24 = vector.load %arg8[%c0_14, %c0_15] : memref<4x1xf32, #tpu.memory_space<vmem>>, vector<4x1xf32>
    %25 = vector.broadcast %24 : vector<4x1xf32> to vector<4x256xf32>
    %26 = arith.addf %23, %25 : vector<4x256xf32>
    %c0_16 = arith.constant 0 : index
    %c0_17 = arith.constant 0 : index
    %27 = vector.load %arg6[%c0_16, %c0_17] : memref<4x32xf32, #tpu.memory_space<vmem>>, vector<4x32xf32>
    %cst_18 = arith.constant dense<0.000000e+00> : vector<4x256xf32>
    %28 = tpu.matmul %27, %20, %cst_18 {dimension_numbers = #tpu.dot_dimension_numbers<[1], [0], [0], [1], [0, 0, 1, 1], [], []>} : vector<4x32xf32>, vector<32x256xf32>, vector<4x256xf32> -> vector<4x256xf32>
    %29 = arith.addf %26, %28 : vector<4x256xf32>
    %c0_19 = arith.constant 0 : index
    %c0_20 = arith.constant 0 : index
    %c0_21 = arith.constant 0 : index
    %30 = vector.load %arg9[%c0_19, %c0_20, %c0_21] : memref<1x4x256xf32, #tpu.memory_space<vmem>>, vector<1x4x256xf32>
    %31 = vector.shape_cast %30 : vector<1x4x256xf32> to vector<4x256xf32>
    %32 = vector.shape_cast %29 : vector<4x256xf32> to vector<1x4x256xf32>
    tpu.vector_store %arg9[%c0_19, %c0_20, %c0_21], %32 {strides = array<i32>} : memref<1x4x256xf32, #tpu.memory_space<vmem>>, vector<1x4x256xf32>,
    return
  }
  func.func @transform_0(%arg0: i32, %arg1: i32) -> (i32, i32, i32) {
    %c0_i32 = arith.constant 0 : i32
    %c0_i32_0 = arith.constant 0 : i32
    return %arg0, %c0_i32, %arg1 : i32, i32, i32
  }
  func.func @transform_1(%arg0: i32, %arg1: i32) -> (i32, i32, i32) {
    %c0_i32 = arith.constant 0 : i32
    %c0_i32_0 = arith.constant 0 : i32
    %c0_i32_1 = arith.constant 0 : i32
    return %arg0, %c0_i32, %c0_i32_0 : i32, i32, i32
  }
  func.func @transform_2(%arg0: i32, %arg1: i32) -> (i32, i32) {
    %c0_i32 = arith.constant 0 : i32
    %c0_i32_0 = arith.constant 0 : i32
    %c0_i32_1 = arith.constant 0 : i32
    return %c0_i32, %c0_i32_0 : i32, i32
  }
  func.func @transform_3(%arg0: i32, %arg1: i32) -> (i32, i32) {
    %c0_i32 = arith.constant 0 : i32
    %c0_i32_0 = arith.constant 0 : i32
    %c0_i32_1 = arith.constant 0 : i32
    return %c0_i32, %c0_i32_0 : i32, i32
  }
  func.func @transform_4(%arg0: i32, %arg1: i32) -> (i32, i32) {
    %c0_i32 = arith.constant 0 : i32
    %c0_i32_0 = arith.constant 0 : i32
    %c0_i32_1 = arith.constant 0 : i32
    return %c0_i32, %c0_i32_0 : i32, i32
  }
  func.func @transform_5(%arg0: i32, %arg1: i32) -> (i32, i32) {
    %c0_i32 = arith.constant 0 : i32
    %c0_i32_0 = arith.constant 0 : i32
    %c0_i32_1 = arith.constant 0 : i32
    return %c0_i32, %c0_i32_0 : i32, i32
  }
  func.func @transform_6(%arg0: i32, %arg1: i32) -> (i32, i32) {
    %c0_i32 = arith.constant 0 : i32
    %c0_i32_0 = arith.constant 0 : i32
    %c0_i32_1 = arith.constant 0 : i32
    return %c0_i32, %c0_i32_0 : i32, i32
  }
  func.func @transform_7(%arg0: i32, %arg1: i32) -> (i32, i32, i32) {
    %c0_i32 = arith.constant 0 : i32
    %c0_i32_0 = arith.constant 0 : i32
    return %arg0, %c0_i32, %arg1 : i32, i32, i32
  }
}

</mosaic_0001>

<bundles_post_ra>
// kernel: tpu_custom_call.1
= control target key start
LH: loop header
LB: loop body
LE: loop exit
PB: predicated region body
PF: predicated region fallthrough
CT: control target
= control target key end

     0   :  { %12 = vsyncpa [#allocation3], 0  ;;  %s1348_s0 = inlined_call_operand.vmem [shape: f32[2,4,256], index: 0, kind: input, shape index: {}]   ;;  %s1349_s1 = inlined_call_operand.vmem [shape: f32[2,32,1], index: 1, kind: input, shape index: {}]   ;;  %s1350_s2 = inlined_call_operand.vmem [shape: f32[68,4], index: 2, kind: input, shape index: {}]   ;;  %s1351_s3 = inlined_call_operand.vmem [shape: f32[36,32], index: 3, kind: input, shape index: {}]   ;;  %s1352_s4 = inlined_call_operand.vmem [shape: f32[4,32], index: 4, kind: input, shape index: {}]   ;;  %s1353_s5 = inlined_call_operand.vmem [shape: f32[32,1], index: 5, kind: input, shape index: {}]   ;;  %s1354_s6 = inlined_call_operand.vmem [shape: f32[4,1], index: 6, kind: input, shape index: {}]   ;;  %s1355_s7 = inlined_call_operand.hbm [shape: f32[2,4,256], index: 7, kind: output, shape index: {}]  }
   0x1   :  { %14 = vsyncpa [#allocation3 + $0x1], 0  ;;  %s1143_s24 = smov 0   ;;  %s1145_s25 = smov 0  }
   0x2   :  { %s1147_s26 = smov 0   ;;  %s1149_s27 = smov 0  }
   0x3   :  { %s1151_s28 = smov 0   ;;  %s1153_s29 = smov 0  }
   0x4 LB: > { %s893_s30 = sadd.s32 4294967295, %s1098_s29   ;;  %s894_s8 = sadd.s32 4294967294, %s1098_s29   ;;  %s1098_s29 = sphi %s1153_s29, %s20_s29   ;;  %s1094_s28 = sphi %s1151_s28, %s1362_s28   ;;  %s1090_s27 = sphi %s1149_s27, %s1361_s27   ;;  %s1086_s26 = sphi %s1147_s26, %s1360_s26   ;;  %s1082_s25 = sphi %s1145_s25, %s1359_s25   ;;  %s1078_s24 = sphi %s1143_s24, %s1358_s24  }
   0x5   : > { %s32_s9 = sadd.s32 1, %s1094_s28  ;;  %s200_s10 = sadd.s32 1, %s1086_s26 }
   0x6   : > { %p34_p0 = scmp.ge.s32.totalorder %s32_s9, 2  ;;  %p210_p1 = scmp.ne.s32.totalorder %s1086_s26, %s1082_s25 }
   0x7   : > { %p211_p2 = scmp.eq.s32.totalorder %s893_s30, 1  ;;  %p216_p3 = scmp.ne.s32.totalorder %s1082_s25, %s1078_s24 }
   0x8   : > { %s1364_s9 = smov (%p34_p0, %s32_s9), 0  ;;  %p217_p5 = scmp.eq.s32.totalorder %s894_s8, 1 }
   0x9   : > { %p1183_p4 = por %p211_p2, %p210_p1  ;;  %s195_s12 = ssub.s32 %s1094_s28, %s1364_s9 }
   0xa   : > { %p897_p6 = scmp.ge.s32.totalorder %s1098_s29, 1  ;;  %p198_p7 = scmp.eq.s32.totalorder %s195_s12, 0 }
   0xb   : > { %p1190_p8 = por %p217_p5, %p216_p3  ;;  %p271_p9 = scmp.lt.s32.totalorder %s1098_s29, 3 }
   0xc   : > { %s1196_s14 = scalar_select %p198_p7, %s1086_s26, %s200_s10  }
   0xd   : > { %p272_p10 = pnand %p897_p6, %p271_p9 }
   0xe   : > { %p313_p11 = scmp.lt.s32.totalorder (!%p272_p10), %s1090_s27, 1  ;;  %v1100_v0 = vmov (!%p272_p10), 0.0   ;;  %v1101_v1 = vmov (!%p272_p10), 0   ;;  %vm368_vm0 = vcmask (!%p272_p10), 1043456   ;;  %v329_v6 = vld [vmem:[%s1350_s2] sm:$0xff] (!%p272_p10)  ;;  %vm340_vm1 = vcmask (!%p272_p10), 31744  }
   0xf   : > { %275 = sbr.rel (%p272_p10) target bundleno = 730 (0x2da), region = 48  ;;  %437 = vmatprep.mubr.f32.mxu0 (!%p272_p10), %v1100_v0  ;;  %449 = vmatprep.mubr.f32.mxu1 (!%p272_p10), %v1100_v0  ;;  %v331_v7 = vld [vmem:[%s1350_s2 + $0x10] sm:$0xff] (!%p272_p10)  ;;  %v330_v10 = vld [vmem:[%s1350_s2 + $0x8] sm:$0xff] (!%p272_p10)  ;;  %v332_v11 = vld [vmem:[%s1350_s2 + $0x18] sm:$0xff] (!%p272_p10)  ;;  %vm537_vm2 = vcmask (!%p272_p10), 261120   ;;  %s309_s8 = sand.u32 (!%p272_p10), 1, %s1082_s25  }
  0x10   : > { %1017 = vset.pattern.permute.xlu0 (!%p272_p10), %v1101_v1  ;;  %1018 = vset.pattern.permute.xlu1 (!%p272_p10), %v1101_v1  ;;  %v656_v12 = vld [vmem:[%s1353_s5] sm:$0xff] (!%p272_p10)  ;;  %v657_v13 = vld [vmem:[%s1353_s5 + $0x8] sm:$0xff] (!%p272_p10)  ;;  %v658_v15 = vld [vmem:[%s1353_s5 + $0x10] sm:$0xff] (!%p272_p10)  ;;  %s898_s10 = sshll.u32 (!%p272_p10), %s309_s8, 3  ;;  %s927_s12 = sshll.u32 (!%p272_p10), %s1090_s27, 7 }
  0x11   : > { %v333_v14 = vld [vmem:[%s1350_s2 + $0x20] sm:$0xff] (!%p272_p10)  ;;  %v659_v16 = vld [vmem:[%s1353_s5 + $0x18] sm:$0xff] (!%p272_p10)  ;;  %v334_v17 = vld [vmem:[%s1350_s2 + $0x28] sm:$0xff] (!%p272_p10)  ;;  %s1301_s19 = scalar_lea.hbm (!%p272_p10), %s1355_s7, %s927_s12 }
  0x12   : > { %v698_v18 = vld [vmem:[%s1354_s6] sm:$0xf] (!%p272_p10)  ;;  %v335_v19 = vld [vmem:[%s1350_s2 + $0x30] sm:$0xff] (!%p272_p10)  ;;  %v336_v20 = vld [vmem:[%s1350_s2 + $0x38] sm:$0xff] (!%p272_p10) }
  0x13   : > { %v337_v21 = vld [vmem:[%s1350_s2 + $0x40] sm:$0xf] (!%p272_p10)  ;;  %v533_v63 = vld [vmem:[%s1351_s3 + $0x8] sm:$0xff] (!%p272_p10) }
  0x14   : > { %v532_v59 = vld [vmem:[%s1351_s3] sm:$0xff] (!%p272_p10) }
  0x16   : > { %s314_s15 = scalar_select %p313_p11, %s1090_s27, 1 }
  0x17   : > { %s1102_s27 = smov [#allocation2]  }
  0x18   : > { %s925_s16 = sshll.u32 %s314_s15, 3  ;;  %s926_s17 = sshll.u32 %s314_s15, 5 }
  0x19   : > { %s320_s20 = scalar_lea.vmem %s1348_s0, %s925_s16  ;;  %s326_s23 = scalar_lea.vmem %s1349_s1, %s926_s17 }
  0x1a   : > { %v328_v2 = vld [vmem:[%s320_s20] sm:$0xff]  ;;  %v494_v5 = vld [vmem:[%s326_s23 + $0x10] sm:$0xff]  ;;  %v493_v8 = vld [vmem:[%s326_s23 + $0x8] sm:$0xff]  ;;  %s311_s15 = scalar_lea.vmem [#allocation2], %s898_s10  ;;  %s789_s20 = scalar_lea.sflag [#allocation3], %s309_s8 }
  0x1b   : > { %v492_v3 = vld [vmem:[%s326_s23] sm:$0xff]  ;;  %v339_v4 = vcombine.high %v328_v2, %v328_v2  ;;  %508 = vperm.xlu1 %1018, %v494_v5   ;;  %v495_v9 = vld [vmem:[%s326_s23 + $0x18] sm:$0xff]  ;;  %s805_s16 = sshll.u32 %s311_s15, 4  ;;  %s1024_s22 = sshll.u32 %s1102_s27, 4  ;;  %s1303_s16 = int_to_ptr.vmem [resolvable:$true] %s805_s16  ;;  %s1025_s22 = int_to_ptr.vmem [resolvable:$false] %s1024_s22 }
  0x1c   : > { %498 = vperm.xlu0 %1017, %v492_v3   ;;  %v534_v3 = vld [vmem:[%s1351_s3 + $0x10] sm:$0xff]  ;;  %v536_v5 = vld [vmem:[%s1351_s3 + $0x20] sm:$0xf]  ;;  %s1020_s21 = scalar_lea.vmem %s1303_s16, 128  ;;  %s1026_s23 = scalar_lea.vmem %s1025_s22, 256 }
  0x1d   : > { %903 = vmatprep.subr.msk.mxu0 %vm368_vm0, %v339_v4  ;;  %944 = vmatprep.subr.msk.mxu1 %vm368_vm0, %v339_v4  ;;  %v535_v4 = vld [vmem:[%s1351_s3 + $0x18] sm:$0xff]  ;;  %p1021_p12 = scmp.ne.s32.totalorder %s1303_s16, %s1020_s21  ;;  %p1027_p1 = scmp.lt.s32.totalorder %s1303_s16, %s1025_s22 }
  0x1e   : > { %904 = vmatpush1.msk.msra.mxu0 %vm368_vm0, %v328_v2  ;;  %945 = vmatpush1.msk.msra.mxu1 %vm368_vm0, %v328_v2  ;;  %p1028_p2 = scmp.lt.s32.totalorder %s1026_s23, %s1020_s21 }
  0x1f   : > { %905 = vmatmul.mubr.msk.f32.vlgmr.msra.gmra.mrb[0].mxu0 %vm340_vm1, %v329_v6  ;;  %907 = vmatmul.mubr.msk.f32.vlgmr.msra.gmra.mrb[0].mxu1 %vm340_vm1, %v331_v7  ;;  %p1022_p13 = pnand %p1021_p12, %p1183_p4 }
  0x20   : > { %443 = vmatprep.mubr.f32.mxu0 %v1100_v0  ;;  %455 = vmatprep.mubr.f32.mxu1 %v1100_v0  ;;  %p1029_p3 = por %p1028_p2, %p1027_p1 }
  0x21   : > { %503 = vperm.xlu0 %1017, %v493_v8   ;;  %513 = vperm.xlu1 %1018, %v495_v9   ;;  %p1023_p0 = pneg %p1022_p13 }
  0x23   : > { %906 = vmatmul.mubr.msk.f32.gmra.mrb[2].mxu0 %vm340_vm1, %v330_v10  ;;  %908 = vmatmul.mubr.msk.f32.gmra.mrb[2].mxu1 %vm340_vm1, %v332_v11  ;;  %p1030_p5 = pnand %p1029_p3, %p1023_p0 }
  0x24   : > { %461 = vmatprep.mubr.f32.mxu1 %v1100_v0  ;;  %617 = vmatprep.mubr.f32.mxu0 %v1100_v0 }
  0x25   : > { %662 = vperm.xlu0 %1017, %v656_v12   ;;  %667 = vperm.xlu1 %1018, %v657_v13  }
  0x27   : > { %909 = vmatmul.mubr.msk.f32.gmra.mrb[4].mxu1 %vm340_vm1, %v333_v14 }
  0x28   : > { %467 = vmatprep.mubr.f32.mxu1 %v1100_v0 }
  0x29   : > { %672 = vperm.xlu0 %1017, %v658_v15   ;;  %677 = vperm.xlu1 %1018, %v659_v16  }
  0x2b   : > { %910 = vmatmul.mubr.msk.f32.gmra.mrb[6].mxu1 %vm340_vm1, %v334_v17 }
  0x2c   : > { %473 = vmatprep.mubr.f32.mxu1 %v1100_v0 }
  0x2d   : > { %701 = vperm.xlu0 %1017, %v698_v18  }
  0x2f   : > { %911 = vmatmul.mubr.msk.f32.gmra.mrb[8].mxu1 %vm340_vm1, %v335_v19 }
  0x30   : > { %479 = vmatprep.mubr.f32.mxu1 %v1100_v0 }
  0x33   : > { %912 = vmatmul.mubr.msk.f32.gmra.mrb[10].mxu1 %vm340_vm1, %v336_v20 }
  0x34   : > { %485 = vmatprep.mubr.f32.mxu1 %v1100_v0 }
  0x37   : > { %913 = vmatmul.mubr.msk.f32.gmra.mrb[12].mxu1 %vm340_vm1, %v337_v21 }
  0x9a   : > { %v509_v23 = vpop.permute.xlu1 %508 }
  0x9b   : > { %v499_v22 = vpop.permute.xlu0 %498 }
  0xa0   : > { %v504_v30 = vpop.permute.xlu0 %503  ;;  %v514_v31 = vpop.permute.xlu1 %513 }
  0xa4   : > { %v663_v10 = vpop.permute.xlu0 %662  ;;  %v668_v15 = vpop.permute.xlu1 %667 }
  0xf2   : > { %v439_v24 = vpop.f32.mrb[0].mxu0  ;;  %v451_v25 = vpop.f32.mrb[0].mxu1 }
  0xf3   : > { %v441_v26 = vpop.f32.mrb[1].mxu0  ;;  %v520_v27 = vadd.f32 %v509_v23, %v451_v25  ;;  %v453_v28 = vpop.f32.mrb[1].mxu1  ;;  %v516_v32 = vadd.f32 %v499_v22, %v439_v24 }
  0xf4   : > { %v521_v29 = vadd.f32 %v509_v23, %v453_v28  ;;  %v517_v33 = vadd.f32 %v499_v22, %v441_v26  ;;  %v673_v28 = vpop.permute.xlu0 %672 }
  0xf5   : > { %v528_v36 = vmax.f32 %v520_v27, 0.0  ;;  %v524_v44 = vmax.f32 %v516_v32, 0.0 }
  0xf6   : > { %v445_v34 = vpop.f32.mrb[2].mxu0  ;;  %v457_v35 = vpop.f32.mrb[2].mxu1  ;;  %v529_v41 = vmax.f32 %v521_v29, 0.0  ;;  %v525_v47 = vmax.f32 %v517_v33, 0.0 }
  0xf7   : > { %v518_v37 = vadd.f32 %v504_v30, %v445_v34  ;;  %v522_v38 = vadd.f32 %v514_v31, %v457_v35  ;;  %v447_v39 = vpop.f32.mrb[3].mxu0  ;;  %v459_v40 = vpop.f32.mrb[3].mxu1 }
  0xf8   : > { %v519_v42 = vadd.f32 %v504_v30, %v447_v39  ;;  %v523_v43 = vadd.f32 %v514_v31, %v459_v40  ;;  %v678_v34 = vpop.permute.xlu1 %677 }
  0xf9   : > { %v526_v45 = vmax.f32 %v518_v37, 0.0  ;;  %v530_v46 = vmax.f32 %v522_v38, 0.0 }
  0xfa   : > { %v527_v48 = vmax.f32 %v519_v42, 0.0  ;;  %v531_v49 = vmax.f32 %v523_v43, 0.0  ;;  %v463_v50 = vpop.f32.mrb[4].mxu1 }
  0xfb   : > { %v930_v51 = vpack.c.bf16 %v526_v45, %v524_v44  ;;  %v934_v52 = vpack.c.bf16 %v530_v46, %v528_v36  ;;  %v465_v53 = vpop.f32.mrb[5].mxu1  ;;  %v706_v45 = vld [vmem:[%s1352_s4] sm:$0xf]  ;;  %v702_v46 = vpop.permute.xlu0 %701 }
  0xfc   : > { %v928_v54 = vpack.c.bf16 %v527_v48, %v525_v47  ;;  %v932_v55 = vpack.c.bf16 %v531_v49, %v529_v41 }
  0xfe   : > { %929 = vmatprep.subr.bf16.mxu0 %v928_v54  ;;  %v469_v56 = vpop.f32.mrb[6].mxu1 }
  0xff   : > { %931 = vmatpush1.bf16.msra.mxu0 %v930_v51  ;;  %v471_v57 = vpop.f32.mrb[7].mxu1 }
 0x100   : > { %933 = vmatprep.subr.bf16.mxu0 %v932_v55 }
 0x102   : > { %v475_v58 = vpop.f32.mrb[8].mxu1 }
 0x103   : > { %935 = vmatpush1.bf16.msra.mxu0 %v934_v52  ;;  %v477_v60 = vpop.f32.mrb[9].mxu1 }
 0x106   : > { %914 = vmatmul.mubr.msk.f32.vlgmr.msra.gmra.mrb[4].mxu0 %vm537_vm2, %v532_v59  ;;  %v481_v61 = vpop.f32.mrb[10].mxu1 }
 0x107   : > { %v483_v62 = vpop.f32.mrb[11].mxu1  ;;  %623 = vmatprep.mubr.f32.mxu0 %v1100_v0 }
 0x10a   : > { %v487_v1 = vpop.f32.mrb[12].mxu1  ;;  %915 = vmatmul.mubr.msk.f32.gmra.mrb[6].mxu0 %vm537_vm2, %v533_v63 }
 0x10b   : > { %v489_v2 = vpop.f32.mrb[13].mxu1  ;;  %629 = vmatprep.mubr.f32.mxu0 %v1100_v0  ;;  %v954_v47 = vadd.f32 %v702_v46, %v487_v1 }
 0x10c   : > { %v956_v48 = vadd.f32 %v702_v46, %v489_v2 }
 0x10e   : > { %916 = vmatmul.mubr.msk.f32.gmra.mrb[8].mxu0 %vm537_vm2, %v534_v3 }
 0x10f   : > { %635 = vmatprep.mubr.f32.mxu0 %v1100_v0 }
 0x112   : > { %917 = vmatmul.mubr.msk.f32.gmra.mrb[10].mxu0 %vm537_vm2, %v535_v4 }
 0x113   : > { %641 = vmatprep.mubr.f32.mxu0 %v1100_v0 }
 0x116   : > { %918 = vmatmul.mubr.msk.f32.gmra.mrb[12].mxu0 %vm537_vm2, %v536_v5 }
 0x117   : > { %774 = vmatprep.mubr.f32.mxu0 %v1100_v0 }
 0x1d9   : > { %v619_v6 = vpop.f32.mrb[4].mxu0 }
 0x1da   : > { %v648_v7 = vadd.f32 %v619_v6, %v463_v50  ;;  %v621_v8 = vpop.f32.mrb[5].mxu0 }
 0x1db   : > { %v649_v9 = vadd.f32 %v621_v8, %v465_v53 }
 0x1dc   : > { %v680_v12 = vadd.f32 %v663_v10, %v648_v7 }
 0x1dd   : > { %v625_v11 = vpop.f32.mrb[6].mxu0  ;;  %v681_v16 = vadd.f32 %v663_v10, %v649_v9 }
 0x1de   : > { %v650_v13 = vadd.f32 %v625_v11, %v469_v56  ;;  %v627_v14 = vpop.f32.mrb[7].mxu0  ;;  %v688_v21 = vmax.f32 %v680_v12, 0.0 }
 0x1df   : > { %v651_v17 = vadd.f32 %v627_v14, %v471_v57  ;;  %v689_v0 = vmax.f32 %v681_v16, 0.0 }
 0x1e0   : > { %v682_v18 = vadd.f32 %v668_v15, %v650_v13 }
 0x1e1   : > { %v683_v19 = vadd.f32 %v668_v15, %v651_v17  ;;  %v631_v20 = vpop.f32.mrb[8].mxu0 }
 0x1e2   : > { %v690_v22 = vmax.f32 %v682_v18, 0.0  ;;  %v652_v23 = vadd.f32 %v631_v20, %v475_v58  ;;  %v633_v24 = vpop.f32.mrb[9].mxu0 }
 0x1e3   : > { %v691_v25 = vmax.f32 %v683_v19, 0.0  ;;  %v653_v26 = vadd.f32 %v633_v24, %v477_v60 }
 0x1e4   : > { %v938_v27 = vpack.c.bf16 %v690_v22, %v688_v21  ;;  %v684_v31 = vadd.f32 %v673_v28, %v652_v23 }
 0x1e5   : > { %v637_v29 = vpop.f32.mrb[10].mxu0  ;;  %v936_v30 = vpack.c.bf16 %v691_v25, %v689_v0  ;;  %v685_v35 = vadd.f32 %v673_v28, %v653_v26 }
 0x1e6   : > { %v654_v32 = vadd.f32 %v637_v29, %v481_v61  ;;  %v639_v33 = vpop.f32.mrb[11].mxu0  ;;  %v692_v39 = vmax.f32 %v684_v31, 0.0 }
 0x1e7   : > { %v655_v36 = vadd.f32 %v639_v33, %v483_v62  ;;  %937 = vmatprep.subr.bf16.mxu0 %v936_v30  ;;  %v693_v41 = vmax.f32 %v685_v35, 0.0 }
 0x1e8   : > { %v686_v37 = vadd.f32 %v678_v34, %v654_v32  ;;  %939 = vmatpush1.bf16.msra.mxu0 %v938_v27 }
 0x1e9   : > { %v687_v38 = vadd.f32 %v678_v34, %v655_v36 }
 0x1ea   : > { %v694_v40 = vmax.f32 %v686_v37, 0.0 }
 0x1eb   : > { %v695_v42 = vmax.f32 %v687_v38, 0.0 }
 0x1ec   : > { %v942_v43 = vpack.c.bf16 %v694_v40, %v692_v39 }
 0x1ed   : > { %v940_v44 = vpack.c.bf16 %v695_v42, %v693_v41 }
 0x1ef   : > { %941 = vmatprep.subr.bf16.mxu0 %v940_v44 }
 0x1f0   : > { %943 = vmatpush1.bf16.msra.mxu0 %v942_v43 }
 0x1f3   : > { %919 = vmatmul.mubr.msk.f32.vlgmr.msra.gmra.mrb[12].mxu0 %vm537_vm2, %v706_v45 }
 0x2c6   : > { %v776_v49 = vpop.f32.mrb[12].mxu0 }
 0x2c7   : > { %v955_v50 = vadd.f32 %v954_v47, %v776_v49  ;;  %v778_v51 = vpop.f32.mrb[13].mxu0 }
 0x2c8   : > { %v957_v52 = vadd.f32 %v956_v48, %v778_v51 }
 0x2ca   : > { %v785_v53 = vcombine.low %v955_v50, %v957_v52 }
 0x2cc   : > { %787 = vst [vmem:[%s311_s15] sm:$0xff] %v785_v53 }
 0x2cd   : > { %1033 = shalt.err (!%p1030_p5)
}
 0x2ce   : > { %s1034_s30 = scalar_lea.hbm %s1301_s19, 128  ;;  %s1038_s12 = scalar_lea.hbm %s1355_s7, 256 }
 0x2cf   : > { %p1035_p6 = scmp.ne.s32.totalorder %s1301_s19, %s1034_s30  ;;  %p1039_p10 = scmp.lt.u32.totalorder %s1301_s19, %s1355_s7 }
 0x2d0   : > { %p1040_p11 = scmp.lt.u32.totalorder %s1038_s12, %s1034_s30  ;;  %p1042_p13 = scmp.lt.u32.totalorder %s1034_s30, %s1301_s19 }
 0x2d1   : > { %p1036_p7 = pnand %p1035_p6, %p1183_p4 }
 0x2d2   : > { %p1041_p12 = por %p1040_p11, %p1039_p10 }
 0x2d3   : > { %p1037_p9 = pneg %p1036_p7 }
 0x2d4   : > { %p1043_p0 = por %p1042_p13, %p1041_p12 }
 0x2d6   : > { %p1044_p1 = pnand %p1043_p0, %p1037_p9 }
 0x2d8   : > { %1047 = shalt.err (!%p1044_p1)
}
 0x2d9   : > { %960 = dma.vmem_to_hbm [thread:$0]  (%p1183_p4), %s1303_s16, 128, %s1301_s19, %s789_s20  }
 0x2da PF: > { %p966_p2 = scmp.ge.s32.totalorder %s1098_s29, 2  ;;  %s817_s18 = sand.u32 1, %s1078_s24  }
 0x2db   : > { %s818_s21 = scalar_lea.sflag [#allocation3], %s817_s18 }
 0x2dc   : > { %p963_p3 = pnand %p966_p2, %p1190_p8 }
 0x2de   : > { %1073 = dma.done.wait (!%p963_p3), %s818_s21, 128  }
 0x2df   : > { %1075 = vsyncadd (!%p963_p3), %s818_s21, 4294967168  ;;  %s20_s29 = sadd.s32 1, %s1098_s29   ;;  %s1358_s24 = smov %s1082_s25 }
 0x2e0   : > { %p17_p5 = scmp.ge.s32.totalorder %s20_s29, 4   ;;  %s1359_s25 = smov %s1086_s26 }
 0x2e1   : > { %s1360_s26 = smov %s1196_s14  ;;  %s1361_s27 = smov %s1094_s28 }
 0x2e2   : > { %s1362_s28 = smov %s1364_s9  ;;  %19 = sbr.rel (!%p17_p5) target bundleno = 4 (0x4), region = 86 }
 0x2e9   :  { %823 = vsyncpa [#allocation3], 1 }
 0x2ea   :  { %825 = vsyncpa [#allocation3 + $0x1], 1 }

</bundles_post_ra>
